<compile_context>
chip_gen: v5e
topology: v5e:2x2
jax: 0.10.0
libtpu: 0.0.40
codegen_flags: <defaults>
</compile_context>

<pallas_src>
import functools

import jax
import jax.numpy as jnp
from jax.experimental import pallas as pl
from jax.experimental.pallas import tpu as pltpu


def _setnet_kernel(
    D,                # static: per-request feature dim
    n_req_ref,        # (TB, 1) int32
    x_inst_ref,       # (TB, I)
    x_req_ref,        # (TB, N*D)   flattened request set
    w_in_ref,         # (N*D, N*H)  blockdiag(req_input.weight^T)
    w1_ref,           # (N*H, N*E1) blockdiag(req_embed1.weight^T)
    w2_ref,           # (N*E1, E2)  vstack_N(req_embed2.weight^T)
    wc_inst_ref,      # (I, C)      concat_input.weight^T (inst columns)
    wc_req_ref,       # (E2, C)     concat_input.weight^T (req-embed columns)
    bc_ref,           # (1, C)      concat_input.bias
    wo_ref,           # (1, C)      concat_output.weight (row vector)
    bo_ref,           # (1, 1)      concat_output.bias
    out_ref,          # (TB, 1)
):
    xr = x_req_ref[...]                                   # (TB, N*D) f32

    # Mask padded requests on the *input* lanes: lane index n*D + d is valid
    # iff n < n_req  <=>  lane < n_req * D.  (ReLU(0)=0 + bias-free linears
    # make zeroed inputs drop out of the set-sum exactly.)
    thresh = n_req_ref[...] * D                           # (TB, 1) int32
    lane = jax.lax.broadcasted_iota(jnp.int32, xr.shape, 1)
    xr = jnp.where(lane < thresh, xr, 0.0)

    # Per-request MLP, all requests of all TB samples in two MXU matmuls.
    h = jnp.dot(xr, w_in_ref[...], preferred_element_type=jnp.float32)
    h = jnp.maximum(h, 0.0)                               # (TB, N*H)
    e1 = jnp.dot(h, w1_ref[...], preferred_element_type=jnp.float32)
    e1 = jnp.maximum(e1, 0.0)                             # (TB, N*E1)

    # Set-sum + req_embed2 fused: e1_cat @ vstack(W2^T) == (sum_n e1_n) @ W2^T
    e2 = jnp.dot(e1, w2_ref[...], preferred_element_type=jnp.float32)
    e2 = jnp.maximum(e2, 0.0)                             # (TB, E2)

    # concat(x_inst, e2) @ Wc^T + bc == x_inst @ Wc_inst + e2 @ Wc_req + bc
    xi = x_inst_ref[...]                                  # (TB, I)
    c = (jnp.dot(xi, wc_inst_ref[...], preferred_element_type=jnp.float32)
         + jnp.dot(e2, wc_req_ref[...], preferred_element_type=jnp.float32)
         + bc_ref[...])
    c = jnp.maximum(c, 0.0)                               # (TB, C)

    # Final (C -> 1) layer as a reduction (avoids a skinny (C,1) matmul).
    y = jnp.sum(c * wo_ref[...], axis=-1, keepdims=True) + bo_ref[...]
    out_ref[...] = y                                      # (TB, 1)


@functools.partial(jax.jit, static_argnames=("tb",))
def set_network_forward(x_inst, x_req, params, x_n_req=None, tb=None):
    """Pallas forward for SetNetwork. Grid iterates over batch tiles of TB samples."""
    B, I = x_inst.shape
    _, N, D = x_req.shape

    # ---- batch tile size (multiple of 8 sublanes), pad B up to a multiple ----
    if tb is None:
        tb = min(512, B)          # bigger tile = fewer grid steps; VMEM use is tiny
    tb = max(8, -(-int(tb) // 8) * 8)
    B_pad = -(-B // tb) * tb
    pad = B_pad - B

    x_inst = x_inst.astype(jnp.float32)
    x_req = x_req.astype(jnp.float32)
    if pad:
        x_inst = jnp.pad(x_inst, ((0, pad), (0, 0)))
        x_req = jnp.pad(x_req, ((0, pad), (0, 0), (0, 0)))
    x_req_flat = x_req.reshape(B_pad, N * D)

    if x_n_req is None:
        n_req = jnp.full((B_pad, 1), N, dtype=jnp.int32)
    else:
        n_req = x_n_req.reshape(-1).astype(jnp.int32)
        if pad:
            n_req = jnp.pad(n_req, (0, pad))
        n_req = n_req.reshape(B_pad, 1)

    # ---- fold the per-request MLP into block-diagonal / tiled weights ----
    eye_n = jnp.eye(N, dtype=jnp.float32)
    w_in_bd = jnp.kron(eye_n, params["req_input_w"].T.astype(jnp.float32))   # (N*D, N*H)
    w1_bd = jnp.kron(eye_n, params["req_embed1_w"].T.astype(jnp.float32))    # (N*H, N*E1)
    w2_t = jnp.tile(params["req_embed2_w"].T.astype(jnp.float32), (N, 1))    # (N*E1, E2)

    wc = params["concat_input_w"].astype(jnp.float32)    # (C, I+E2) torch layout
    wc_inst = wc[:, :I].T                                # (I, C)
    wc_req = wc[:, I:].T                                 # (E2, C)
    bc = params["concat_input_b"].astype(jnp.float32).reshape(1, -1)          # (1, C)
    wo = params["concat_output_w"].astype(jnp.float32).reshape(1, -1)         # (1, C)
    bo = params["concat_output_b"].astype(jnp.float32).reshape(1, 1)          # (1, 1)

    NH = w_in_bd.shape[1]
    NE1 = w1_bd.shape[1]
    E2 = w2_t.shape[1]
    C = wc_inst.shape[1]

    row = lambda shape: pl.BlockSpec(shape, lambda g: (g, 0))
    full = lambda shape: pl.BlockSpec(shape, lambda g: tuple(0 for _ in shape))

    grid_spec = pltpu.PrefetchScalarGridSpec(
        num_scalar_prefetch=0,
        grid=(B_pad // tb,),
        in_specs=[
            row((tb, 1)),            # n_req
            row((tb, I)),            # x_inst
            row((tb, N * D)),        # x_req_flat
            full((N * D, NH)),       # w_in_bd   (VMEM-resident, constant index)
            full((NH, NE1)),         # w1_bd
            full((NE1, E2)),         # w2_t
            full((I, C)),            # wc_inst
            full((E2, C)),           # wc_req
            full((1, C)),            # bc
            full((1, C)),            # wo
            full((1, 1)),            # bo
        ],
        out_specs=row((tb, 1)),
    )

    out = pl.pallas_call(
        functools.partial(_setnet_kernel, D),
        out_shape=jax.ShapeDtypeStruct((B_pad, 1), jnp.float32),
        grid_spec=grid_spec,
        compiler_params=pltpu.CompilerParams(dimension_semantics=("parallel",)),
    )(n_req, x_inst, x_req_flat, w_in_bd, w1_bd, w2_t,
      wc_inst, wc_req, bc, wo, bo)

    return out[:B]


def set_network_reference(x_inst, x_req, params, x_n_req=None):
    """Pure-JAX reference mirroring the PyTorch forward (ReLU, no dropout)."""
    relu = lambda x: jnp.maximum(x, 0.0)
    B, N, _ = x_req.shape
    h = relu(x_req @ params["req_input_w"].T)              # (B, N, H)
    e1 = relu(h @ params["req_embed1_w"].T)                # (B, N, E1)
    if x_n_req is not None:
        mask = (jnp.arange(N)[None, :] < x_n_req[:, None])[..., None]
        e1 = jnp.where(mask, e1, 0.0)
    s = jnp.sum(e1, axis=1)                                # (B, E1)
    e2 = relu(s @ params["req_embed2_w"].T)                # (B, E2)
    x = jnp.concatenate([x_inst, e2], axis=1)
    c = relu(x @ params["concat_input_w"].T + params["concat_input_b"])
    return c @ params["concat_output_w"].T + params["concat_output_b"]


def make_params(key, inst_input_dim, req_input_dim, req_hidden_dim,
                req_embed_dim1, req_embed_dim2, concat_hidden_dim):
    ks = jax.random.split(key, 7)
    scale = 0.1
    return {
        "req_input_w": scale * jax.random.normal(ks[0], (req_hidden_dim, req_input_dim), jnp.float32),
        "req_embed1_w": scale * jax.random.normal(ks[1], (req_embed_dim1, req_hidden_dim), jnp.float32),
        "req_embed2_w": scale * jax.random.normal(ks[2], (req_embed_dim2, req_embed_dim1), jnp.float32),
        "concat_input_w": scale * jax.random.normal(
            ks[3], (concat_hidden_dim, inst_input_dim + req_embed_dim2), jnp.float32),
        "concat_input_b": scale * jax.random.normal(ks[4], (concat_hidden_dim,), jnp.float32),
        "concat_output_w": scale * jax.random.normal(ks[5], (1, concat_hidden_dim), jnp.float32),
        "concat_output_b": scale * jax.random.normal(ks[6], (1,), jnp.float32),
    }


if __name__ == "__main__":
    # small, forward-consistent shapes
    N_REQ = 8
    INST_DIM = 6
    REQ_DIM = 4
    REQ_HID = 16
    REQ_E1 = 16
    REQ_E2 = 8
    CONCAT_HID = 32

    key = jax.random.PRNGKey(0)
    k_inst, k_req, k_par, k_n = jax.random.split(key, 4)
    params = make_params(k_par, INST_DIM, REQ_DIM, REQ_HID, REQ_E1, REQ_E2, CONCAT_HID)

    # --- test 1: tiny batch, variable set sizes ---
    B = 2
    x_inst = jax.random.normal(k_inst, (B, INST_DIM), jnp.float32)
    x_req = jax.random.normal(k_req, (B, N_REQ, REQ_DIM), jnp.float32)
    x_n_req = jnp.array([5, 8], dtype=jnp.int32)

    out = set_network_forward(x_inst, x_req, params, x_n_req=x_n_req)
    out = jax.block_until_ready(out)
    ref = set_network_reference(x_inst, x_req, params, x_n_req=x_n_req)
    assert out.shape == (B, 1)
    assert jnp.allclose(out, ref, atol=1e-5, rtol=1e-5), (out, ref)

    # --- test 2: x_n_req=None path ---
    out2 = jax.block_until_ready(set_network_forward(x_inst, x_req, params))
    ref2 = set_network_reference(x_inst, x_req, params)
    assert jnp.allclose(out2, ref2, atol=1e-5, rtol=1e-5), (out2, ref2)

    # --- test 3: multi-tile grid with batch padding (exercises TB tiling) ---
    B3 = 20
    ki, kr, kn = jax.random.split(jax.random.PRNGKey(1), 3)
    x_inst3 = jax.random.normal(ki, (B3, INST_DIM), jnp.float32)
    x_req3 = jax.random.normal(kr, (B3, N_REQ, REQ_DIM), jnp.float32)
    x_n_req3 = jax.random.randint(kn, (B3,), 1, N_REQ + 1).astype(jnp.int32)
    out3 = jax.block_until_ready(
        set_network_forward(x_inst3, x_req3, params, x_n_req=x_n_req3, tb=8))
    ref3 = set_network_reference(x_inst3, x_req3, params, x_n_req=x_n_req3)
    assert out3.shape == (B3, 1)
    assert jnp.allclose(out3, ref3, atol=1e-5, rtol=1e-5), (out3, ref3)

    print("KERNEL_OK")
</pallas_src>

<mosaic_0001>
module attributes {stable_mosaic.version = 11 : i64} {
  func.func @_setnet_kernel(%arg0: i32, %arg1: memref<8x1xi32, #tpu.memory_space<vmem>>, %arg2: memref<8x6xf32, #tpu.memory_space<vmem>>, %arg3: memref<8x32xf32, #tpu.memory_space<vmem>>, %arg4: memref<32x128xf32, #tpu.memory_space<vmem>>, %arg5: memref<128x128xf32, #tpu.memory_space<vmem>>, %arg6: memref<128x8xf32, #tpu.memory_space<vmem>>, %arg7: memref<6x32xf32, #tpu.memory_space<vmem>>, %arg8: memref<8x32xf32, #tpu.memory_space<vmem>>, %arg9: memref<1x32xf32, #tpu.memory_space<vmem>>, %arg10: memref<1x32xf32, #tpu.memory_space<vmem>>, %arg11: memref<1x1xf32, #tpu.memory_space<vmem>>, %arg12: memref<8x1xf32, #tpu.memory_space<vmem>>) attributes {dimension_semantics = [#tpu.dimension_semantics<parallel>], iteration_bounds = array<i64: 1>, scalar_prefetch = 0 : i64, scratch_operands = 0 : i64, tpu.core_type = #tpu.core_type<tc>, window_params = [{transform_indices = @transform_0, window_bounds = array<i64: 8, 1>}, {transform_indices = @transform_1, window_bounds = array<i64: 8, 6>}, {transform_indices = @transform_2, window_bounds = array<i64: 8, 32>}, {pipeline_mode = #tpu.pipeline_mode<synchronous>, transform_indices = @transform_3, window_bounds = array<i64: 32, 128>}, {pipeline_mode = #tpu.pipeline_mode<synchronous>, transform_indices = @transform_4, window_bounds = array<i64: 128, 128>}, {pipeline_mode = #tpu.pipeline_mode<synchronous>, transform_indices = @transform_5, window_bounds = array<i64: 128, 8>}, {pipeline_mode = #tpu.pipeline_mode<synchronous>, transform_indices = @transform_6, window_bounds = array<i64: 6, 32>}, {pipeline_mode = #tpu.pipeline_mode<synchronous>, transform_indices = @transform_7, window_bounds = array<i64: 8, 32>}, {pipeline_mode = #tpu.pipeline_mode<synchronous>, transform_indices = @transform_8, window_bounds = array<i64: 1, 32>}, {pipeline_mode = #tpu.pipeline_mode<synchronous>, transform_indices = @transform_9, window_bounds = array<i64: 1, 32>}, {pipeline_mode = #tpu.pipeline_mode<synchronous>, transform_indices = @transform_10, window_bounds = array<i64: 1, 1>}, {transform_indices = @transform_11, window_bounds = array<i64: 8, 1>}]} {
    %c0 = arith.constant 0 : index
    %c0_0 = arith.constant 0 : index
    %0 = vector.load %arg3[%c0, %c0_0] : memref<8x32xf32, #tpu.memory_space<vmem>>, vector<8x32xf32>
    %c0_1 = arith.constant 0 : index
    %c0_2 = arith.constant 0 : index
    %1 = vector.load %arg1[%c0_1, %c0_2] : memref<8x1xi32, #tpu.memory_space<vmem>>, vector<8x1xi32>
    %c4_i32 = arith.constant 4 : i32
    %2 = vector.broadcast %c4_i32 : i32 to vector<8x1xi32>
    %3 = arith.muli %1, %2 : vector<8x1xi32>
    %4 = tpu.iota {dimensions = array<i32: 1>} : vector<8x32xi32>
    %5 = vector.broadcast %3 : vector<8x1xi32> to vector<8x32xi32>
    %6 = arith.cmpi slt, %4, %5 : vector<8x32xi32>
    %cst = arith.constant 0.000000e+00 : f32
    %7 = vector.broadcast %cst : f32 to vector<8x32xf32>
    %8 = arith.select %6, %0, %7 : vector<8x32xi1>, vector<8x32xf32>
    %c0_3 = arith.constant 0 : index
    %c0_4 = arith.constant 0 : index
    %9 = vector.load %arg4[%c0_3, %c0_4] : memref<32x128xf32, #tpu.memory_space<vmem>>, vector<32x128xf32>
    %cst_5 = arith.constant dense<0.000000e+00> : vector<8x128xf32>
    %10 = tpu.matmul %8, %9, %cst_5 {dimension_numbers = #tpu.dot_dimension_numbers<[1], [0], [0], [1], [0, 0, 1, 1], [], []>} : vector<8x32xf32>, vector<32x128xf32>, vector<8x128xf32> -> vector<8x128xf32>
    %cst_6 = arith.constant 0.000000e+00 : f32
    %11 = vector.broadcast %cst_6 : f32 to vector<8x128xf32>
    %12 = arith.maximumf %10, %11 : vector<8x128xf32>
    %c0_7 = arith.constant 0 : index
    %c0_8 = arith.constant 0 : index
    %13 = vector.load %arg5[%c0_7, %c0_8] : memref<128x128xf32, #tpu.memory_space<vmem>>, vector<128x128xf32>
    %cst_9 = arith.constant dense<0.000000e+00> : vector<8x128xf32>
    %14 = tpu.matmul %12, %13, %cst_9 {dimension_numbers = #tpu.dot_dimension_numbers<[1], [0], [0], [1], [0, 0, 1, 1], [], []>} : vector<8x128xf32>, vector<128x128xf32>, vector<8x128xf32> -> vector<8x128xf32>
    %cst_10 = arith.constant 0.000000e+00 : f32
    %15 = vector.broadcast %cst_10 : f32 to vector<8x128xf32>
    %16 = arith.maximumf %14, %15 : vector<8x128xf32>
    %c0_11 = arith.constant 0 : index
    %c0_12 = arith.constant 0 : index
    %17 = vector.load %arg6[%c0_11, %c0_12] : memref<128x8xf32, #tpu.memory_space<vmem>>, vector<128x8xf32>
    %cst_13 = arith.constant dense<0.000000e+00> : vector<8x8xf32>
    %18 = tpu.matmul %16, %17, %cst_13 {dimension_numbers = #tpu.dot_dimension_numbers<[1], [0], [0], [1], [0, 0, 1, 1], [], []>} : vector<8x128xf32>, vector<128x8xf32>, vector<8x8xf32> -> vector<8x8xf32>
    %cst_14 = arith.constant 0.000000e+00 : f32
    %19 = vector.broadcast %cst_14 : f32 to vector<8x8xf32>
    %20 = arith.maximumf %18, %19 : vector<8x8xf32>
    %c0_15 = arith.constant 0 : index
    %c0_16 = arith.constant 0 : index
    %21 = vector.load %arg2[%c0_15, %c0_16] : memref<8x6xf32, #tpu.memory_space<vmem>>, vector<8x6xf32>
    %c0_17 = arith.constant 0 : index
    %c0_18 = arith.constant 0 : index
    %22 = vector.load %arg7[%c0_17, %c0_18] : memref<6x32xf32, #tpu.memory_space<vmem>>, vector<6x32xf32>
    %cst_19 = arith.constant dense<0.000000e+00> : vector<8x32xf32>
    %23 = tpu.matmul %21, %22, %cst_19 {dimension_numbers = #tpu.dot_dimension_numbers<[1], [0], [0], [1], [0, 0, 1, 1], [], []>} : vector<8x6xf32>, vector<6x32xf32>, vector<8x32xf32> -> vector<8x32xf32>
    %c0_20 = arith.constant 0 : index
    %c0_21 = arith.constant 0 : index
    %24 = vector.load %arg8[%c0_20, %c0_21] : memref<8x32xf32, #tpu.memory_space<vmem>>, vector<8x32xf32>
    %cst_22 = arith.constant dense<0.000000e+00> : vector<8x32xf32>
    %25 = tpu.matmul %20, %24, %cst_22 {dimension_numbers = #tpu.dot_dimension_numbers<[1], [0], [0], [1], [0, 0, 1, 1], [], []>} : vector<8x8xf32>, vector<8x32xf32>, vector<8x32xf32> -> vector<8x32xf32>
    %26 = arith.addf %23, %25 : vector<8x32xf32>
    %c0_23 = arith.constant 0 : index
    %c0_24 = arith.constant 0 : index
    %27 = vector.load %arg9[%c0_23, %c0_24] : memref<1x32xf32, #tpu.memory_space<vmem>>, vector<1x32xf32>
    %28 = vector.broadcast %27 : vector<1x32xf32> to vector<8x32xf32>
    %29 = arith.addf %26, %28 : vector<8x32xf32>
    %cst_25 = arith.constant 0.000000e+00 : f32
    %30 = vector.broadcast %cst_25 : f32 to vector<8x32xf32>
    %31 = arith.maximumf %29, %30 : vector<8x32xf32>
    %c0_26 = arith.constant 0 : index
    %c0_27 = arith.constant 0 : index
    %32 = vector.load %arg10[%c0_26, %c0_27] : memref<1x32xf32, #tpu.memory_space<vmem>>, vector<1x32xf32>
    %33 = vector.broadcast %32 : vector<1x32xf32> to vector<8x32xf32>
    %34 = arith.mulf %31, %33 : vector<8x32xf32>
    %cst_28 = arith.constant dense<0.000000e+00> : vector<8xf32>
    %35 = vector.multi_reduction <add>, %34, %cst_28 [1] : vector<8x32xf32> to vector<8xf32>
    %36 = vector.shape_cast %35 : vector<8xf32> to vector<8x1xf32>
    %c0_29 = arith.constant 0 : index
    %c0_30 = arith.constant 0 : index
    %37 = vector.load %arg11[%c0_29, %c0_30] : memref<1x1xf32, #tpu.memory_space<vmem>>, vector<1x1xf32>
    %38 = vector.broadcast %37 : vector<1x1xf32> to vector<8x1xf32>
    %39 = arith.addf %36, %38 : vector<8x1xf32>
    %c0_31 = arith.constant 0 : index
    %c0_32 = arith.constant 0 : index
    %40 = vector.load %arg12[%c0_31, %c0_32] : memref<8x1xf32, #tpu.memory_space<vmem>>, vector<8x1xf32>
    tpu.vector_store %arg12[%c0_31, %c0_32], %39 {strides = array<i32>} : memref<8x1xf32, #tpu.memory_space<vmem>>, vector<8x1xf32>,
    return
  }
  func.func @transform_0(%arg0: i32) -> (i32, i32) {
    %c0_i32 = arith.constant 0 : i32
    %c0_i32_0 = arith.constant 0 : i32
    return %arg0, %c0_i32 : i32, i32
  }
  func.func @transform_1(%arg0: i32) -> (i32, i32) {
    %c0_i32 = arith.constant 0 : i32
    %c0_i32_0 = arith.constant 0 : i32
    return %arg0, %c0_i32 : i32, i32
  }
  func.func @transform_2(%arg0: i32) -> (i32, i32) {
    %c0_i32 = arith.constant 0 : i32
    %c0_i32_0 = arith.constant 0 : i32
    return %arg0, %c0_i32 : i32, i32
  }
  func.func @transform_3(%arg0: i32) -> (i32, i32) {
    %c0_i32 = arith.constant 0 : i32
    %c0_i32_0 = arith.constant 0 : i32
    %c0_i32_1 = arith.constant 0 : i32
    return %c0_i32, %c0_i32_0 : i32, i32
  }
  func.func @transform_4(%arg0: i32) -> (i32, i32) {
    %c0_i32 = arith.constant 0 : i32
    %c0_i32_0 = arith.constant 0 : i32
    %c0_i32_1 = arith.constant 0 : i32
    return %c0_i32, %c0_i32_0 : i32, i32
  }
  func.func @transform_5(%arg0: i32) -> (i32, i32) {
    %c0_i32 = arith.constant 0 : i32
    %c0_i32_0 = arith.constant 0 : i32
    %c0_i32_1 = arith.constant 0 : i32
    return %c0_i32, %c0_i32_0 : i32, i32
  }
  func.func @transform_6(%arg0: i32) -> (i32, i32) {
    %c0_i32 = arith.constant 0 : i32
    %c0_i32_0 = arith.constant 0 : i32
    %c0_i32_1 = arith.constant 0 : i32
    return %c0_i32, %c0_i32_0 : i32, i32
  }
  func.func @transform_7(%arg0: i32) -> (i32, i32) {
    %c0_i32 = arith.constant 0 : i32
    %c0_i32_0 = arith.constant 0 : i32
    %c0_i32_1 = arith.constant 0 : i32
    return %c0_i32, %c0_i32_0 : i32, i32
  }
  func.func @transform_8(%arg0: i32) -> (i32, i32) {
    %c0_i32 = arith.constant 0 : i32
    %c0_i32_0 = arith.constant 0 : i32
    %c0_i32_1 = arith.constant 0 : i32
    return %c0_i32, %c0_i32_0 : i32, i32
  }
  func.func @transform_9(%arg0: i32) -> (i32, i32) {
    %c0_i32 = arith.constant 0 : i32
    %c0_i32_0 = arith.constant 0 : i32
    %c0_i32_1 = arith.constant 0 : i32
    return %c0_i32, %c0_i32_0 : i32, i32
  }
  func.func @transform_10(%arg0: i32) -> (i32, i32) {
    %c0_i32 = arith.constant 0 : i32
    %c0_i32_0 = arith.constant 0 : i32
    %c0_i32_1 = arith.constant 0 : i32
    return %c0_i32, %c0_i32_0 : i32, i32
  }
  func.func @transform_11(%arg0: i32) -> (i32, i32) {
    %c0_i32 = arith.constant 0 : i32
    %c0_i32_0 = arith.constant 0 : i32
    return %arg0, %c0_i32 : i32, i32
  }
}

</mosaic_0001>

<bundles_post_ra>
// kernel: set_network_forward.1
= control target key start
LH: loop header
LB: loop body
LE: loop exit
PB: predicated region body
PF: predicated region fallthrough
CT: control target
= control target key end

     0   :  { %v242_v0 = vmov 0   ;;  %v43_v19 = vlaneseq  ;;  %vm54_vm0 = vcmask 261120   ;;  %vm184_vm2 = vcmask 1045504   ;;  %s440_s0 = inlined_call_operand.vmem [shape: s32[8,1], index: 0, kind: input, shape index: {}]   ;;  %s441_s3 = inlined_call_operand.vmem [shape: f32[32,128], index: 3, kind: input, shape index: {}]   ;;  %s442_s4 = inlined_call_operand.vmem [shape: f32[128,128], index: 4, kind: input, shape index: {}]   ;;  %s443_s2 = inlined_call_operand.vmem [shape: f32[8,32], index: 2, kind: input, shape index: {}]   ;;  %s444_s5 = inlined_call_operand.vmem [shape: f32[128,8], index: 5, kind: input, shape index: {}]   ;;  %s445_s7 = inlined_call_operand.vmem [shape: f32[8,32], index: 7, kind: input, shape index: {}]   ;;  %s446_s6 = inlined_call_operand.vmem [shape: f32[6,32], index: 6, kind: input, shape index: {}]   ;;  %s447_s1 = inlined_call_operand.vmem [shape: f32[8,6], index: 1, kind: input, shape index: {}]   ;;  %s448_s8 = inlined_call_operand.vmem [shape: f32[1,32], index: 8, kind: input, shape index: {}]   ;;  %s449_s9 = inlined_call_operand.vmem [shape: f32[1,32], index: 9, kind: input, shape index: {}]   ;;  %s450_s10 = inlined_call_operand.<no memory space> [shape: f32[1,1], index: 10, kind: input, shape index: {}]   ;;  %s451_s11 = inlined_call_operand.vmem [shape: f32[8,1], index: 11, kind: output, shape index: {}]  }
   0x1   :  { %238 = vset.pattern.permute.xlu0 %v242_v0  ;;  %v41_v1 = vld [vmem:[%s440_s0] sm:$0xff]  ;;  %v53_v2 = vld [vmem:[%s441_s3 + $0x18] sm:$0xff]  ;;  %v52_v3 = vld [vmem:[%s441_s3 + $0x10] sm:$0xff]  ;;  %vm156_vm3 = vcmask 64512   ;;  %vm180_vm4 = vcmask 48128   ;;  %v16_v53 = vstv %s450_s10  ;;  %vm227_vm5 = vcmask 7168  }
   0x2   :  { %v42_v4 = vmul.u32 4, %v41_v1  ;;  %70 = vmatpush.msra.mxu0 %v53_v2  ;;  %v51_v5 = vld [vmem:[%s441_s3 + $0x8] sm:$0xff]  ;;  %v50_v6 = vld [vmem:[%s441_s3] sm:$0xff]  ;;  %v94_v7 = vld [vmem:[%s442_s4 + $0x78] sm:$0xff]  ;;  %v44_v22 = vand.u32 127, %v43_v19 }
   0x3   :  { %v93_v8 = vld [vmem:[%s442_s4 + $0x70] sm:$0xff]  ;;  %95 = vmatpush.msra.mxu1 %v94_v7  ;;  %v92_v9 = vld [vmem:[%s442_s4 + $0x68] sm:$0xff]  ;;  %v91_v10 = vld [vmem:[%s442_s4 + $0x60] sm:$0xff]  ;;  %17 = vst [vmem:[#allocation2] sm:$0x1] %v16_v53 }
   0x4   :  { %46 = vperm.xlu0 %238, %v42_v4   ;;  %71 = vmatpush.msra.mxu0 %v52_v3  ;;  %v90_v11 = vld [vmem:[%s442_s4 + $0x58] sm:$0xff]  ;;  %v89_v12 = vld [vmem:[%s442_s4 + $0x50] sm:$0xff]  ;;  %v88_v13 = vld [vmem:[%s442_s4 + $0x48] sm:$0xff] }
   0x5   :  { %96 = vmatpush.msra.mxu1 %v93_v8  ;;  %v87_v14 = vld [vmem:[%s442_s4 + $0x40] sm:$0xff]  ;;  %v86_v15 = vld [vmem:[%s442_s4 + $0x38] sm:$0xff]  ;;  %v85_v16 = vld [vmem:[%s442_s4 + $0x30] sm:$0xff] }
   0x6   :  { %72 = vmatpush.msra.mxu0 %v51_v5  ;;  %v84_v17 = vld [vmem:[%s442_s4 + $0x28] sm:$0xff]  ;;  %v83_v18 = vld [vmem:[%s442_s4 + $0x20] sm:$0xff]  ;;  %v82_v20 = vld [vmem:[%s442_s4 + $0x18] sm:$0xff] }
   0x7   :  { %97 = vmatpush.msra.mxu1 %v92_v9  ;;  %v81_v21 = vld [vmem:[%s442_s4 + $0x10] sm:$0xff]  ;;  %v40_v23 = vld [vmem:[%s443_s2] sm:$0xff]  ;;  %v80_v26 = vld [vmem:[%s442_s4 + $0x8] sm:$0xff] }
   0x8   :  { %73 = vmatpush.msra.mxu0 %v50_v6  ;;  %v79_v27 = vld [vmem:[%s442_s4] sm:$0xff]  ;;  %v131_v28 = vld [vmem:[%s444_s5 + $0x78] sm:$0xff]  ;;  %v130_v29 = vld [vmem:[%s444_s5 + $0x70] sm:$0xff] }
   0x9   :  { %98 = vmatpush.msra.mxu1 %v91_v10  ;;  %132 = vmatpush.msra.mxu2 %v131_v28  ;;  %v129_v30 = vld [vmem:[%s444_s5 + $0x68] sm:$0xff]  ;;  %v128_v31 = vld [vmem:[%s444_s5 + $0x60] sm:$0xff]  ;;  %v127_v32 = vld [vmem:[%s444_s5 + $0x58] sm:$0xff] }
   0xa   :  { %v126_v33 = vld [vmem:[%s444_s5 + $0x50] sm:$0xff]  ;;  %v125_v34 = vld [vmem:[%s444_s5 + $0x48] sm:$0xff]  ;;  %v124_v35 = vld [vmem:[%s444_s5 + $0x40] sm:$0xff] }
   0xb   :  { %99 = vmatpush.msra.mxu1 %v90_v11  ;;  %133 = vmatpush.msra.mxu2 %v130_v29  ;;  %v123_v36 = vld [vmem:[%s444_s5 + $0x38] sm:$0xff]  ;;  %v122_v37 = vld [vmem:[%s444_s5 + $0x30] sm:$0xff]  ;;  %v121_v38 = vld [vmem:[%s444_s5 + $0x28] sm:$0xff] }
   0xc   :  { %v120_v39 = vld [vmem:[%s444_s5 + $0x20] sm:$0xff]  ;;  %v119_v40 = vld [vmem:[%s444_s5 + $0x18] sm:$0xff]  ;;  %v118_v41 = vld [vmem:[%s444_s5 + $0x10] sm:$0xff] }
   0xd   :  { %100 = vmatpush.msra.mxu1 %v89_v12  ;;  %134 = vmatpush.msra.mxu2 %v129_v30  ;;  %v117_v44 = vld [vmem:[%s444_s5 + $0x8] sm:$0xff]  ;;  %v116_v45 = vld [vmem:[%s444_s5] sm:$0xff] }
   0xe   :  { %v155_v48 = vld [vmem:[%s445_s7] sm:$0xff] }
   0xf   :  { %101 = vmatpush.msra.mxu1 %v88_v13  ;;  %135 = vmatpush.msra.mxu2 %v128_v31  ;;  %v154_v49 = vld [vmem:[%s446_s6] sm:$0x3f] }
  0x10   :  { %175 = vmatpush.msra.mxu3 %v155_v48  ;;  %v153_v52 = vld [vmem:[%s447_s1] sm:$0xff] }
  0x11   :  { %102 = vmatpush.msra.mxu1 %v87_v14  ;;  %136 = vmatpush.msra.mxu2 %v127_v32  ;;  %v239_v55 = vld [vmem:[%s448_s8] ss:$0 sm:$0xff] }
  0x12   :  { %235 = vmatpush.msk.msrb.mxu3 %vm184_vm2, %v154_v49  ;;  %v240_v59 = vld [vmem:[%s449_s9] ss:$0 sm:$0xff] }
  0x13   :  { %103 = vmatpush.msra.mxu1 %v86_v15  ;;  %137 = vmatpush.msra.mxu2 %v126_v33  ;;  %v241_v63 = vld [vmem:[#allocation2] ss:$0 sm:$0xff] }
  0x15   :  { %104 = vmatpush.msra.mxu1 %v85_v16  ;;  %138 = vmatpush.msra.mxu2 %v125_v34 }
  0x17   :  { %105 = vmatpush.msra.mxu1 %v84_v17  ;;  %139 = vmatpush.msra.mxu2 %v124_v35 }
  0x19   :  { %106 = vmatpush.msra.mxu1 %v83_v18  ;;  %140 = vmatpush.msra.mxu2 %v123_v36 }
  0x1b   :  { %107 = vmatpush.msra.mxu1 %v82_v20  ;;  %141 = vmatpush.msra.mxu2 %v122_v37 }
  0x1d   :  { %108 = vmatpush.msra.mxu1 %v81_v21  ;;  %142 = vmatpush.msra.mxu2 %v121_v38 }
  0x1f   :  { %109 = vmatpush.msra.mxu1 %v80_v26  ;;  %143 = vmatpush.msra.mxu2 %v120_v39 }
  0x21   :  { %110 = vmatpush.msra.mxu1 %v79_v27  ;;  %144 = vmatpush.msra.mxu2 %v119_v40 }
  0x23   :  { %145 = vmatpush.msra.mxu2 %v118_v41 }
  0x25   :  { %146 = vmatpush.msra.mxu2 %v117_v44 }
  0x27   :  { %147 = vmatpush.msra.mxu2 %v116_v45 }
  0x76   :  { %v47_v24 = vpop.permute.xlu0 %46 }
  0x77   :  { %vm48_vm1 = vcmp.lt.s32.totalorder %v44_v22, %v47_v24 }
  0x78   :  { %v49_v25 = vsel %vm48_vm1, %v40_v23, 0.0 }
  0x79   :  { %233 = vmatmul.msk.f32.vlgmr.msra.gmra.mxu0 %vm54_vm0, %v49_v25 }
  0xf6   :  { %v75_v42 = vpop.f32.mrf.mxu0 }
  0xf7   :  { %v78_v43 = vmax.f32 %v75_v42, 0.0 }
  0xf9   :  { %111 = vmatmul.f32.vlgmr.msra.gmra.mxu1 %v78_v43 }
 0x176   :  { %v112_v46 = vpop.f32.mrf.mxu1 }
 0x177   :  { %v115_v47 = vmax.f32 %v112_v46, 0.0 }
 0x179   :  { %148 = vmatmul.f32.vlgmr.msra.gmra.mxu2 %v115_v47 }
 0x1fc   :  { %v149_v50 = vpop.f32.mrf.mxu2 }
 0x1fd   :  { %v152_v51 = vmax.f32 %v149_v50, 0.0 }
 0x1ff   :  { %234 = vmatmul.msk.f32.vlgmr.msra.gmra.mxu3 %vm156_vm3, %v152_v51 }
 0x207   :  { %236 = vmatmul.msk.f32.vlgmr.msrb.gmra.mxu3 %vm180_vm4, %v153_v52 }
 0x282   :  { %v177_v54 = vpop.f32.mrf.mxu3 }
 0x28a   :  { %v205_v56 = vpop.f32.mrf.mxu3 }
 0x28b   :  { %v206_v57 = vadd.f32 %v205_v56, %v177_v54 }
 0x28d   :  { %v212_v58 = vadd.f32 %v239_v55, %v206_v57 }
 0x28f   :  { %v213_v60 = vmax.f32 %v212_v58, 0.0 }
 0x291   :  { %v218_v61 = vmul.f32 %v240_v59, %v213_v60 }
 0x293   :  { %v219_v62 = vsel %vm54_vm0, %v218_v61, 0.0 }
 0x294   :  { %220 = vadd.xlane.f32.xlu0 %v219_v62 }
 0x307   :  { %v221_v0 = vpop.xlane.xlu0 %220 }
 0x308   :  { %v226_v1 = vadd.f32 %v241_v63, %v221_v0 }
 0x30a   :  { %228 = vst.msk [vmem:[%s451_s11] sm:$0xff] %vm227_vm5, %v226_v1 }

</bundles_post_ra>
